<compile_context>
chip_gen: v6e
topology: v6e:2x2x1
jax: 0.10.0
libtpu: 0.0.40
codegen_flags: <defaults>
</compile_context>

<pallas_src>
import math
import functools

import jax
import jax.numpy as jnp
from jax.experimental import pallas as pl
from jax.experimental.pallas import tpu as pltpu


# -----------------------------------------------------------------------------
# Kernel A: fused QKV projection -> head-major bf16 q/k/v.
# -----------------------------------------------------------------------------
def _qkv_proj_kernel(x_ref, wqkv_ref, bqkv_ref, q_ref, k_ref, v_ref, *, n_head):
    # x_ref block: (1, TS, C) bf16; wqkv: (C, 3C) bf16; bqkv: (1, 3C) f32.
    # q/k/v out blocks: (1, H, TS, D) bf16.
    x = x_ref[0]                                                         # (TS, C) bf16
    qkv = jnp.dot(x, wqkv_ref[...],
                  preferred_element_type=jnp.float32) + bqkv_ref[...]    # (TS, 3C) f32
    qkv = qkv.astype(jnp.bfloat16)
    c = qkv.shape[1] // 3
    d = c // n_head
    # Pay the head-split relayout exactly once, here.
    for h in range(n_head):
        q_ref[0, h] = qkv[:, h * d:(h + 1) * d]
        k_ref[0, h] = qkv[:, c + h * d:c + (h + 1) * d]
        v_ref[0, h] = qkv[:, 2 * c + h * d:2 * c + (h + 1) * d]


# -----------------------------------------------------------------------------
# Kernel B: flash attention (online softmax over kv tiles) + output projection.
# -----------------------------------------------------------------------------
def _flash_attn_kernel(q_ref, k_ref, v_ref, wp_ref, bp_ref, o_ref,
                       m_ref, l_ref, acc_ref):
    # q_ref: (1, H, TQ, D) bf16 (pre-scaled by 1/sqrt(D));
    # k_ref / v_ref: (1, H, TK, D) bf16; wp_ref: (H, D, C) bf16; bp_ref: (1, C) f32.
    # o_ref: (1, TQ, C); scratch: m/l (H, TQ, 1) f32, acc (H, TQ, D) f32.
    qi = pl.program_id(1)
    ki = pl.program_id(2)
    tq = q_ref.shape[2]
    tk = k_ref.shape[2]
    q_start = qi * tq
    k_start = ki * tk

    @pl.when(ki == 0)
    def _init():
        m_ref[...] = jnp.full(m_ref.shape, -jnp.inf, jnp.float32)
        l_ref[...] = jnp.zeros(l_ref.shape, jnp.float32)
        acc_ref[...] = jnp.zeros(acc_ref.shape, jnp.float32)

    # Causal tile skipping: kv tiles entirely above the diagonal contribute nothing.
    @pl.when(k_start <= q_start + (tq - 1))
    def _compute():
        row = jax.lax.broadcasted_iota(jnp.int32, (tq, tk), 0) + q_start
        col = jax.lax.broadcasted_iota(jnp.int32, (tq, tk), 1) + k_start
        causal = (col <= row)[None, :, :]                                # (1, TQ, TK)

        q = q_ref[0]                                                     # (H, TQ, D) bf16
        k = k_ref[0]                                                     # (H, TK, D) bf16
        v = v_ref[0]                                                     # (H, TK, D) bf16

        # scores = q @ k^T (the 1/sqrt(D) scale is already folded into q).
        s = jnp.einsum('hqd,hkd->hqk', q, k,
                       preferred_element_type=jnp.float32)               # (H, TQ, TK) f32
        s = jnp.where(causal, s, -jnp.inf)

        m_prev = m_ref[...]                                              # (H, TQ, 1)
        m_new = jnp.maximum(m_prev, jnp.max(s, axis=-1, keepdims=True))
        alpha = jnp.exp(m_prev - m_new)
        p = jnp.exp(s - m_new)                                           # (H, TQ, TK) f32
        l_ref[...] = alpha * l_ref[...] + jnp.sum(p, axis=-1, keepdims=True)
        acc_ref[...] = alpha * acc_ref[...] + jnp.einsum(
            'hqk,hkd->hqd', p.astype(jnp.bfloat16), v,
            preferred_element_type=jnp.float32)
        m_ref[...] = m_new

    # Finalize at the last kv tile this query tile attends to (causal), folding the head
    # merge into per-head-batched (TQ, D) @ (D, C) output-projection matmuls summed over
    # heads (no (TQ, C) relayout of the attention output is needed).
    last_ki = (q_start + (tq - 1)) // tk
    @pl.when(ki == last_ki)
    def _finalize():
        inv_l = pl.reciprocal(l_ref[...], approx=True)                   # (H, TQ, 1)
        y = (acc_ref[...] * inv_l).astype(jnp.bfloat16)                  # (H, TQ, D)
        out = jnp.einsum('hqd,hdc->hqc', y, wp_ref[...],
                         preferred_element_type=jnp.float32)             # (H, TQ, C)
        out = jnp.sum(out, axis=0) + bp_ref[...]                         # (TQ, C)
        o_ref[0] = out.astype(o_ref.dtype)


# -----------------------------------------------------------------------------
# Wrapper
# -----------------------------------------------------------------------------
def causal_cross_conditional_self_attention(x, params, n_head, *, seq_tile=128):
    """x: (B, T, C) float32; params: wq/wk/wv/wp (C, C) and bq/bk/bv/bp (1, C) float32."""
    B, T, C = x.shape
    assert C % n_head == 0
    D = C // n_head
    out_dtype = x.dtype
    ts = min(seq_tile, T)
    assert T % ts == 0, "sequence length must be divisible by the sequence tile"
    n_t = T // ts

    scale = 1.0 / math.sqrt(D)
    # Fused QKV weight/bias with the 1/sqrt(D) score scale folded into the Q part.
    wqkv = jnp.concatenate(
        [params["wq"] * scale, params["wk"], params["wv"]], axis=1).astype(jnp.bfloat16)
    bqkv = jnp.concatenate(
        [params["bq"] * scale, params["bk"], params["bv"]], axis=1).astype(jnp.float32)
    # Output projection reshaped per head: wp3[h, d, :] = wp[h*D + d, :].
    wp3 = params["wp"].astype(jnp.bfloat16).reshape(n_head, D, C)
    bp = params["bp"].astype(jnp.float32)
    x_bf = x.astype(jnp.bfloat16)

    # ---- Kernel A: fused QKV projection, head-major bf16 outputs. ----
    qkv_out_shape = jax.ShapeDtypeStruct((B, n_head, T, D), jnp.bfloat16)
    hm_spec = pl.BlockSpec((1, n_head, ts, D), lambda b, t: (b, 0, t, 0))
    q_hm, k_hm, v_hm = pl.pallas_call(
        functools.partial(_qkv_proj_kernel, n_head=n_head),
        out_shape=(qkv_out_shape, qkv_out_shape, qkv_out_shape),
        grid=(B, n_t),
        in_specs=[
            pl.BlockSpec((1, ts, C), lambda b, t: (b, t, 0)),
            pl.BlockSpec((C, 3 * C), lambda b, t: (0, 0)),
            pl.BlockSpec((1, 3 * C), lambda b, t: (0, 0)),
        ],
        out_specs=(hm_spec, hm_spec, hm_spec),
        compiler_params=pltpu.CompilerParams(
            dimension_semantics=("parallel", "parallel")),
    )(x_bf, wqkv, bqkv)

    # ---- Kernel B: flash attention + output projection. ----
    out = pl.pallas_call(
        _flash_attn_kernel,
        out_shape=jax.ShapeDtypeStruct((B, T, C), out_dtype),
        grid=(B, n_t, n_t),
        in_specs=[
            pl.BlockSpec((1, n_head, ts, D), lambda b, qi, ki: (b, 0, qi, 0)),
            pl.BlockSpec((1, n_head, ts, D), lambda b, qi, ki: (b, 0, ki, 0)),
            pl.BlockSpec((1, n_head, ts, D), lambda b, qi, ki: (b, 0, ki, 0)),
            pl.BlockSpec((n_head, D, C), lambda b, qi, ki: (0, 0, 0)),
            pl.BlockSpec((1, C), lambda b, qi, ki: (0, 0)),
        ],
        out_specs=pl.BlockSpec((1, ts, C), lambda b, qi, ki: (b, qi, 0)),
        scratch_shapes=[
            pltpu.VMEM((n_head, ts, 1), jnp.float32),   # running max  m
            pltpu.VMEM((n_head, ts, 1), jnp.float32),   # running sum  l
            pltpu.VMEM((n_head, ts, D), jnp.float32),   # running acc  (unnormalized y)
        ],
        compiler_params=pltpu.CompilerParams(
            dimension_semantics=("parallel", "parallel", "arbitrary")),
    )(q_hm, k_hm, v_hm, wp3, bp)
    return out


# -----------------------------------------------------------------------------
# Test harness
# -----------------------------------------------------------------------------
def _init_linear(key, c_in, c_out):
    """Deterministic PyTorch-Linear-style init: U(-1/sqrt(in), 1/sqrt(in))."""
    kw, kb = jax.random.split(key)
    bound = 1.0 / math.sqrt(c_in)
    w = jax.random.uniform(kw, (c_in, c_out), jnp.float32, -bound, bound)
    b = jax.random.uniform(kb, (1, c_out), jnp.float32, -bound, bound)
    return w, b


def _reference(x, params, n_head):
    """Pure-JAX f32 reference mirroring the PyTorch forward (eval mode)."""
    B, T, C = x.shape
    D = C // n_head
    q = (x @ params["wq"] + params["bq"]).reshape(B, T, n_head, D).transpose(0, 2, 1, 3)
    k = (x @ params["wk"] + params["bk"]).reshape(B, T, n_head, D).transpose(0, 2, 1, 3)
    v = (x @ params["wv"] + params["bv"]).reshape(B, T, n_head, D).transpose(0, 2, 1, 3)
    att = jnp.einsum('bhqd,bhkd->bhqk', q, k) / math.sqrt(D)
    mask = jnp.tril(jnp.ones((T, T)))[None, None]
    att = jnp.where(mask == 0, -jnp.inf, att)
    att = jax.nn.softmax(att, axis=-1)
    y = jnp.einsum('bhqk,bhkd->bhqd', att, v).transpose(0, 2, 1, 3).reshape(B, T, C)
    return y @ params["wp"] + params["bp"]


def _run_case(key, B, T, C, n_head):
    kx, kq, kk, kv, kp = jax.random.split(key, 5)
    x = jax.random.normal(kx, (B, T, C), jnp.float32)
    wq, bq = _init_linear(kq, C, C)
    wk, bk = _init_linear(kk, C, C)
    wv, bv = _init_linear(kv, C, C)
    wp, bp = _init_linear(kp, C, C)
    params = dict(wq=wq, wk=wk, wv=wv, wp=wp, bq=bq, bk=bk, bv=bv, bp=bp)

    out = causal_cross_conditional_self_attention(x, params, n_head)
    out = jax.block_until_ready(out)

    ref = _reference(x, params, n_head)
    assert out.shape == (B, T, C)
    # bf16 MXU inputs + approx-reciprocal normalization => compare against the f32
    # reference with a correspondingly loosened tolerance.
    assert jnp.allclose(out, ref, atol=3e-2, rtol=3e-2), \
        f"mismatch vs reference (B={B}, T={T}, C={C}, H={n_head})"


if __name__ == "__main__":
    # Small shapes consistent with the module: embed_dim % 8 == 0, T == block_size (16).
    key = jax.random.PRNGKey(0)
    k1, k2 = jax.random.split(key)
    _run_case(k1, B=2, T=16, C=32, n_head=4)   # D = 8
    _run_case(k2, B=1, T=16, C=64, n_head=8)   # D = 8, module-default head count
    print("KERNEL_OK")
</pallas_src>

<mosaic_0001>
module attributes {stable_mosaic.version = 11 : i64} {
  func.func @_qkv_proj_kernel(%arg0: i32, %arg1: i32, %arg2: memref<1x16x32xbf16, #tpu.memory_space<vmem>>, %arg3: memref<32x96xbf16, #tpu.memory_space<vmem>>, %arg4: memref<1x96xf32, #tpu.memory_space<vmem>>, %arg5: memref<1x4x16x8xbf16, #tpu.memory_space<vmem>>, %arg6: memref<1x4x16x8xbf16, #tpu.memory_space<vmem>>, %arg7: memref<1x4x16x8xbf16, #tpu.memory_space<vmem>>) attributes {dimension_semantics = [#tpu.dimension_semantics<parallel>, #tpu.dimension_semantics<parallel>], iteration_bounds = array<i64: 2, 1>, scalar_prefetch = 0 : i64, scratch_operands = 0 : i64, tpu.core_type = #tpu.core_type<tc>, window_params = [{transform_indices = @transform_0, window_bounds = array<i64: 1, 16, 32>}, {pipeline_mode = #tpu.pipeline_mode<synchronous>, transform_indices = @transform_1, window_bounds = array<i64: 32, 96>}, {pipeline_mode = #tpu.pipeline_mode<synchronous>, transform_indices = @transform_2, window_bounds = array<i64: 1, 96>}, {transform_indices = @transform_3, window_bounds = array<i64: 1, 4, 16, 8>}, {transform_indices = @transform_4, window_bounds = array<i64: 1, 4, 16, 8>}, {transform_indices = @transform_5, window_bounds = array<i64: 1, 4, 16, 8>}]} {
    %c0 = arith.constant 0 : index
    %c0_0 = arith.constant 0 : index
    %c0_1 = arith.constant 0 : index
    %0 = vector.load %arg2[%c0, %c0_0, %c0_1] : memref<1x16x32xbf16, #tpu.memory_space<vmem>>, vector<1x16x32xbf16>
    %1 = vector.shape_cast %0 : vector<1x16x32xbf16> to vector<16x32xbf16>
    %c0_2 = arith.constant 0 : index
    %c0_3 = arith.constant 0 : index
    %2 = vector.load %arg3[%c0_2, %c0_3] : memref<32x96xbf16, #tpu.memory_space<vmem>>, vector<32x96xbf16>
    %cst = arith.constant dense<0.000000e+00> : vector<16x96xf32>
    %3 = tpu.matmul %1, %2, %cst {dimension_numbers = #tpu.dot_dimension_numbers<[1], [0], [0], [1], [0, 0, 1, 1], [], []>} : vector<16x32xbf16>, vector<32x96xbf16>, vector<16x96xf32> -> vector<16x96xf32>
    %c0_4 = arith.constant 0 : index
    %c0_5 = arith.constant 0 : index
    %4 = vector.load %arg4[%c0_4, %c0_5] : memref<1x96xf32, #tpu.memory_space<vmem>>, vector<1x96xf32>
    %5 = vector.broadcast %4 : vector<1x96xf32> to vector<16x96xf32>
    %6 = arith.addf %3, %5 : vector<16x96xf32>
    %7 = arith.truncf %6 : vector<16x96xf32> to vector<16x96xbf16>
    %8 = vector.extract_strided_slice %7 {offsets = [0, 0], sizes = [16, 8], strides = [1, 1]} : vector<16x96xbf16> to vector<16x8xbf16>
    %c0_6 = arith.constant 0 : index
    %c0_7 = arith.constant 0 : index
    %c0_8 = arith.constant 0 : index
    %c0_9 = arith.constant 0 : index
    %9 = vector.load %arg5[%c0_6, %c0_7, %c0_8, %c0_9] : memref<1x4x16x8xbf16, #tpu.memory_space<vmem>>, vector<1x1x16x8xbf16>
    %10 = vector.shape_cast %9 : vector<1x1x16x8xbf16> to vector<16x8xbf16>
    %11 = vector.shape_cast %8 : vector<16x8xbf16> to vector<1x1x16x8xbf16>
    tpu.vector_store %arg5[%c0_6, %c0_7, %c0_8, %c0_9], %11 {strides = array<i32>} : memref<1x4x16x8xbf16, #tpu.memory_space<vmem>>, vector<1x1x16x8xbf16>,
    %12 = vector.extract_strided_slice %7 {offsets = [0, 32], sizes = [16, 8], strides = [1, 1]} : vector<16x96xbf16> to vector<16x8xbf16>
    %c0_10 = arith.constant 0 : index
    %c0_11 = arith.constant 0 : index
    %c0_12 = arith.constant 0 : index
    %c0_13 = arith.constant 0 : index
    %13 = vector.load %arg6[%c0_10, %c0_11, %c0_12, %c0_13] : memref<1x4x16x8xbf16, #tpu.memory_space<vmem>>, vector<1x1x16x8xbf16>
    %14 = vector.shape_cast %13 : vector<1x1x16x8xbf16> to vector<16x8xbf16>
    %15 = vector.shape_cast %12 : vector<16x8xbf16> to vector<1x1x16x8xbf16>
    tpu.vector_store %arg6[%c0_10, %c0_11, %c0_12, %c0_13], %15 {strides = array<i32>} : memref<1x4x16x8xbf16, #tpu.memory_space<vmem>>, vector<1x1x16x8xbf16>,
    %16 = vector.extract_strided_slice %7 {offsets = [0, 64], sizes = [16, 8], strides = [1, 1]} : vector<16x96xbf16> to vector<16x8xbf16>
    %c0_14 = arith.constant 0 : index
    %c0_15 = arith.constant 0 : index
    %c0_16 = arith.constant 0 : index
    %c0_17 = arith.constant 0 : index
    %17 = vector.load %arg7[%c0_14, %c0_15, %c0_16, %c0_17] : memref<1x4x16x8xbf16, #tpu.memory_space<vmem>>, vector<1x1x16x8xbf16>
    %18 = vector.shape_cast %17 : vector<1x1x16x8xbf16> to vector<16x8xbf16>
    %19 = vector.shape_cast %16 : vector<16x8xbf16> to vector<1x1x16x8xbf16>
    tpu.vector_store %arg7[%c0_14, %c0_15, %c0_16, %c0_17], %19 {strides = array<i32>} : memref<1x4x16x8xbf16, #tpu.memory_space<vmem>>, vector<1x1x16x8xbf16>,
    %20 = vector.extract_strided_slice %7 {offsets = [0, 8], sizes = [16, 8], strides = [1, 1]} : vector<16x96xbf16> to vector<16x8xbf16>
    %c0_18 = arith.constant 0 : index
    %c1 = arith.constant 1 : index
    %c0_19 = arith.constant 0 : index
    %c0_20 = arith.constant 0 : index
    %21 = vector.load %arg5[%c0_18, %c1, %c0_19, %c0_20] : memref<1x4x16x8xbf16, #tpu.memory_space<vmem>>, vector<1x1x16x8xbf16>
    %22 = vector.shape_cast %21 : vector<1x1x16x8xbf16> to vector<16x8xbf16>
    %23 = vector.shape_cast %20 : vector<16x8xbf16> to vector<1x1x16x8xbf16>
    tpu.vector_store %arg5[%c0_18, %c1, %c0_19, %c0_20], %23 {strides = array<i32>} : memref<1x4x16x8xbf16, #tpu.memory_space<vmem>>, vector<1x1x16x8xbf16>,
    %24 = vector.extract_strided_slice %7 {offsets = [0, 40], sizes = [16, 8], strides = [1, 1]} : vector<16x96xbf16> to vector<16x8xbf16>
    %c0_21 = arith.constant 0 : index
    %c1_22 = arith.constant 1 : index
    %c0_23 = arith.constant 0 : index
    %c0_24 = arith.constant 0 : index
    %25 = vector.load %arg6[%c0_21, %c1_22, %c0_23, %c0_24] : memref<1x4x16x8xbf16, #tpu.memory_space<vmem>>, vector<1x1x16x8xbf16>
    %26 = vector.shape_cast %25 : vector<1x1x16x8xbf16> to vector<16x8xbf16>
    %27 = vector.shape_cast %24 : vector<16x8xbf16> to vector<1x1x16x8xbf16>
    tpu.vector_store %arg6[%c0_21, %c1_22, %c0_23, %c0_24], %27 {strides = array<i32>} : memref<1x4x16x8xbf16, #tpu.memory_space<vmem>>, vector<1x1x16x8xbf16>,
    %28 = vector.extract_strided_slice %7 {offsets = [0, 72], sizes = [16, 8], strides = [1, 1]} : vector<16x96xbf16> to vector<16x8xbf16>
    %c0_25 = arith.constant 0 : index
    %c1_26 = arith.constant 1 : index
    %c0_27 = arith.constant 0 : index
    %c0_28 = arith.constant 0 : index
    %29 = vector.load %arg7[%c0_25, %c1_26, %c0_27, %c0_28] : memref<1x4x16x8xbf16, #tpu.memory_space<vmem>>, vector<1x1x16x8xbf16>
    %30 = vector.shape_cast %29 : vector<1x1x16x8xbf16> to vector<16x8xbf16>
    %31 = vector.shape_cast %28 : vector<16x8xbf16> to vector<1x1x16x8xbf16>
    tpu.vector_store %arg7[%c0_25, %c1_26, %c0_27, %c0_28], %31 {strides = array<i32>} : memref<1x4x16x8xbf16, #tpu.memory_space<vmem>>, vector<1x1x16x8xbf16>,
    %32 = vector.extract_strided_slice %7 {offsets = [0, 16], sizes = [16, 8], strides = [1, 1]} : vector<16x96xbf16> to vector<16x8xbf16>
    %c0_29 = arith.constant 0 : index
    %c2 = arith.constant 2 : index
    %c0_30 = arith.constant 0 : index
    %c0_31 = arith.constant 0 : index
    %33 = vector.load %arg5[%c0_29, %c2, %c0_30, %c0_31] : memref<1x4x16x8xbf16, #tpu.memory_space<vmem>>, vector<1x1x16x8xbf16>
    %34 = vector.shape_cast %33 : vector<1x1x16x8xbf16> to vector<16x8xbf16>
    %35 = vector.shape_cast %32 : vector<16x8xbf16> to vector<1x1x16x8xbf16>
    tpu.vector_store %arg5[%c0_29, %c2, %c0_30, %c0_31], %35 {strides = array<i32>} : memref<1x4x16x8xbf16, #tpu.memory_space<vmem>>, vector<1x1x16x8xbf16>,
    %36 = vector.extract_strided_slice %7 {offsets = [0, 48], sizes = [16, 8], strides = [1, 1]} : vector<16x96xbf16> to vector<16x8xbf16>
    %c0_32 = arith.constant 0 : index
    %c2_33 = arith.constant 2 : index
    %c0_34 = arith.constant 0 : index
    %c0_35 = arith.constant 0 : index
    %37 = vector.load %arg6[%c0_32, %c2_33, %c0_34, %c0_35] : memref<1x4x16x8xbf16, #tpu.memory_space<vmem>>, vector<1x1x16x8xbf16>
    %38 = vector.shape_cast %37 : vector<1x1x16x8xbf16> to vector<16x8xbf16>
    %39 = vector.shape_cast %36 : vector<16x8xbf16> to vector<1x1x16x8xbf16>
    tpu.vector_store %arg6[%c0_32, %c2_33, %c0_34, %c0_35], %39 {strides = array<i32>} : memref<1x4x16x8xbf16, #tpu.memory_space<vmem>>, vector<1x1x16x8xbf16>,
    %40 = vector.extract_strided_slice %7 {offsets = [0, 80], sizes = [16, 8], strides = [1, 1]} : vector<16x96xbf16> to vector<16x8xbf16>
    %c0_36 = arith.constant 0 : index
    %c2_37 = arith.constant 2 : index
    %c0_38 = arith.constant 0 : index
    %c0_39 = arith.constant 0 : index
    %41 = vector.load %arg7[%c0_36, %c2_37, %c0_38, %c0_39] : memref<1x4x16x8xbf16, #tpu.memory_space<vmem>>, vector<1x1x16x8xbf16>
    %42 = vector.shape_cast %41 : vector<1x1x16x8xbf16> to vector<16x8xbf16>
    %43 = vector.shape_cast %40 : vector<16x8xbf16> to vector<1x1x16x8xbf16>
    tpu.vector_store %arg7[%c0_36, %c2_37, %c0_38, %c0_39], %43 {strides = array<i32>} : memref<1x4x16x8xbf16, #tpu.memory_space<vmem>>, vector<1x1x16x8xbf16>,
    %44 = vector.extract_strided_slice %7 {offsets = [0, 24], sizes = [16, 8], strides = [1, 1]} : vector<16x96xbf16> to vector<16x8xbf16>
    %c0_40 = arith.constant 0 : index
    %c3 = arith.constant 3 : index
    %c0_41 = arith.constant 0 : index
    %c0_42 = arith.constant 0 : index
    %45 = vector.load %arg5[%c0_40, %c3, %c0_41, %c0_42] : memref<1x4x16x8xbf16, #tpu.memory_space<vmem>>, vector<1x1x16x8xbf16>
    %46 = vector.shape_cast %45 : vector<1x1x16x8xbf16> to vector<16x8xbf16>
    %47 = vector.shape_cast %44 : vector<16x8xbf16> to vector<1x1x16x8xbf16>
    tpu.vector_store %arg5[%c0_40, %c3, %c0_41, %c0_42], %47 {strides = array<i32>} : memref<1x4x16x8xbf16, #tpu.memory_space<vmem>>, vector<1x1x16x8xbf16>,
    %48 = vector.extract_strided_slice %7 {offsets = [0, 56], sizes = [16, 8], strides = [1, 1]} : vector<16x96xbf16> to vector<16x8xbf16>
    %c0_43 = arith.constant 0 : index
    %c3_44 = arith.constant 3 : index
    %c0_45 = arith.constant 0 : index
    %c0_46 = arith.constant 0 : index
    %49 = vector.load %arg6[%c0_43, %c3_44, %c0_45, %c0_46] : memref<1x4x16x8xbf16, #tpu.memory_space<vmem>>, vector<1x1x16x8xbf16>
    %50 = vector.shape_cast %49 : vector<1x1x16x8xbf16> to vector<16x8xbf16>
    %51 = vector.shape_cast %48 : vector<16x8xbf16> to vector<1x1x16x8xbf16>
    tpu.vector_store %arg6[%c0_43, %c3_44, %c0_45, %c0_46], %51 {strides = array<i32>} : memref<1x4x16x8xbf16, #tpu.memory_space<vmem>>, vector<1x1x16x8xbf16>,
    %52 = vector.extract_strided_slice %7 {offsets = [0, 88], sizes = [16, 8], strides = [1, 1]} : vector<16x96xbf16> to vector<16x8xbf16>
    %c0_47 = arith.constant 0 : index
    %c3_48 = arith.constant 3 : index
    %c0_49 = arith.constant 0 : index
    %c0_50 = arith.constant 0 : index
    %53 = vector.load %arg7[%c0_47, %c3_48, %c0_49, %c0_50] : memref<1x4x16x8xbf16, #tpu.memory_space<vmem>>, vector<1x1x16x8xbf16>
    %54 = vector.shape_cast %53 : vector<1x1x16x8xbf16> to vector<16x8xbf16>
    %55 = vector.shape_cast %52 : vector<16x8xbf16> to vector<1x1x16x8xbf16>
    tpu.vector_store %arg7[%c0_47, %c3_48, %c0_49, %c0_50], %55 {strides = array<i32>} : memref<1x4x16x8xbf16, #tpu.memory_space<vmem>>, vector<1x1x16x8xbf16>,
    return
  }
  func.func @transform_0(%arg0: i32, %arg1: i32) -> (i32, i32, i32) {
    %c0_i32 = arith.constant 0 : i32
    %c0_i32_0 = arith.constant 0 : i32
    return %arg0, %arg1, %c0_i32 : i32, i32, i32
  }
  func.func @transform_1(%arg0: i32, %arg1: i32) -> (i32, i32) {
    %c0_i32 = arith.constant 0 : i32
    %c0_i32_0 = arith.constant 0 : i32
    %c0_i32_1 = arith.constant 0 : i32
    return %c0_i32, %c0_i32_0 : i32, i32
  }
  func.func @transform_2(%arg0: i32, %arg1: i32) -> (i32, i32) {
    %c0_i32 = arith.constant 0 : i32
    %c0_i32_0 = arith.constant 0 : i32
    %c0_i32_1 = arith.constant 0 : i32
    return %c0_i32, %c0_i32_0 : i32, i32
  }
  func.func @transform_3(%arg0: i32, %arg1: i32) -> (i32, i32, i32, i32) {
    %c0_i32 = arith.constant 0 : i32
    %c0_i32_0 = arith.constant 0 : i32
    %c0_i32_1 = arith.constant 0 : i32
    return %arg0, %c0_i32, %arg1, %c0_i32_0 : i32, i32, i32, i32
  }
  func.func @transform_4(%arg0: i32, %arg1: i32) -> (i32, i32, i32, i32) {
    %c0_i32 = arith.constant 0 : i32
    %c0_i32_0 = arith.constant 0 : i32
    %c0_i32_1 = arith.constant 0 : i32
    return %arg0, %c0_i32, %arg1, %c0_i32_0 : i32, i32, i32, i32
  }
  func.func @transform_5(%arg0: i32, %arg1: i32) -> (i32, i32, i32, i32) {
    %c0_i32 = arith.constant 0 : i32
    %c0_i32_0 = arith.constant 0 : i32
    %c0_i32_1 = arith.constant 0 : i32
    return %arg0, %c0_i32, %arg1, %c0_i32_0 : i32, i32, i32, i32
  }
}

</mosaic_0001>

<bundles_post_ra>
// kernel: tpu_custom_call.1
= control target key start
LH: loop header
LB: loop body
LE: loop exit
PB: predicated region body
PF: predicated region fallthrough
CT: control target
= control target key end

     0   :  { %11 = vsyncpa [#allocation3], 0  ;;  %s1223_s0 = inlined_call_operand.hbm [shape: bf16[2,16,32], index: 0, kind: input, shape index: {}]   ;;  %s1224_s1 = inlined_call_operand.hbm [shape: bf16[32,96], index: 1, kind: input, shape index: {}]   ;;  %s1225_s2 = inlined_call_operand.vmem [shape: f32[1,96], index: 2, kind: input, shape index: {}]   ;;  %s1226_s3 = inlined_call_operand.vmem [shape: bf16[2,4,16,8], index: 3, kind: output, shape index: {0}]   ;;  %s1227_s4 = inlined_call_operand.vmem [shape: bf16[2,4,16,8], index: 4, kind: output, shape index: {1}]   ;;  %s1228_s5 = inlined_call_operand.vmem [shape: bf16[2,4,16,8], index: 5, kind: output, shape index: {2}]  }
   0x1   :  { %13 = vsyncpa [#allocation3 + $0x1], 0 }
   0x2   :  { %14 = vsyncpa [#allocation5], 0  ;;  %s1026_s18 = smov 0   ;;  %s1028_s19 = smov 0  }
   0x3   :  { %s1030_s20 = smov 0   ;;  %s1032_s21 = smov 0  }
   0x4   :  { %s1034_s22 = smov 0   ;;  %s1036_s23 = smov 0  }
   0x5 LB: > { %s724_s24 = sadd.s32 4294967295, %s977_s23   ;;  %p54_p0 = scmp.ne.s32.totalorder %s961_s19, %s957_s18  ;;  %s977_s23 = sphi %s1036_s23, %s20_s23   ;;  %s973_s22 = sphi %s1034_s22, %s1238_s22   ;;  %s969_s21 = sphi %s1032_s21, %s1237_s21   ;;  %s965_s20 = sphi %s1030_s20, %s1236_s20   ;;  %s961_s19 = sphi %s1028_s19, %s1235_s19   ;;  %s957_s18 = sphi %s1026_s18, %s1234_s18  }
   0x6   : > { %p1056_p1 = scmp.eq.s32.totalorder %s724_s24, 0  ;;  %p726_p2 = scmp.ge.s32.totalorder %s977_s23, 1 }
   0x7   : > { %p191_p3 = scmp.lt.s32.totalorder %s977_s23, 3  ;;  %s979_s28 = smov [#allocation4]  }
   0x8   : > { %p1064_p4 = por %p1056_p1, %p54_p0  ;;  %s203_s29 = sshll.u32 %s979_s28, 4  ;;  %s204_s29 = int_to_ptr.vmem [resolvable:$true] %s203_s29 }
   0x9   : > { %p1068_p5 = pnand %p726_p2, %p191_p3  ;;  %s32_s6 = sadd.s32 1, %s973_s22 }
   0xa   : > { %s880_s7 = scalar_lea.vmem %s204_s29, 256  ;;  %p888_p12 = scmp.lt.s32.totalorder %s204_s29, %s204_s29 }
   0xb   : > { %p791_p6 = pneg %p1068_p5  ;;  %p881_p9 = scmp.ne.s32.totalorder %s204_s29, %s880_s7 }
   0xc   : > { %p889_p13 = scmp.lt.s32.totalorder %s880_s7, %s880_s7 }
   0xd   : > { %p1076_p7 = pnand %p791_p6, %p1056_p1 }
   0xe   : > { %p890_p0 = por %p889_p13, %p888_p12 }
   0xf   : > { %p871_p8 = pneg %p1076_p7 }
  0x11   : > { %p883_p10 = pnand %p881_p9, %p871_p8 }
  0x13   : > { %p884_p11 = pneg %p883_p10 }
  0x15   : > { %p891_p2 = pnand %p890_p0, %p884_p11 }
  0x17   : > { %894 = shalt.err (!%p891_p2)
}
  0x18   : > { %s980_s8 = smov 64   ;;  %s981_s9 = smov 4  }
  0x19   : > { %794 = dma.hbm_to_vmem [thread:$0]  (!%p1076_p7), %s1224_s1, 256, %s204_s29, [#allocation5], %s980_s8, %s980_s8, %s981_s9  }
  0x1a   : > { %p34_p3 = scmp.ge.s32.totalorder %s32_s6, 2  ;;  %s41_s12 = sadd.s32 1, %s965_s20 }
  0x1b   : > { %p48_p6 = scmp.ne.s32.totalorder %s965_s20, %s961_s19  ;;  %p49_p8 = scmp.eq.s32.totalorder %s977_s23, 0 }
  0x1c   : > { %s1240_s6 = smov (%p34_p3, %s32_s6), 0  ;;  %p800_p10 = scmp.lt.s32.totalorder %s977_s23, 2 }
  0x1d   : > { %p50_p9 = por %p49_p8, %p48_p6  ;;  %s36_s13 = ssub.s32 %s973_s22, %s1240_s6 }
  0x1e   : > { %s220_s14 = sand.u32 1, %s965_s20   ;;  %p39_p11 = scmp.eq.s32.totalorder %s36_s13, 0 }
  0x1f   : > { %s729_s15 = sshll.u32 %s220_s14, 3  ;;  %s768_s16 = sshll.u32 %s973_s22, 7 }
  0x20   : > { %s1103_s17 = scalar_select %p39_p11, %s965_s20, %s41_s12  }
  0x21   : > { %s232_s28 = scalar_lea.hbm %s1223_s0, %s768_s16  ;;  %s224_s29 = scalar_lea.vmem [#allocation2], %s729_s15 }
  0x22   : > { %s233_s30 = sshll.u32 %s224_s29, 4  ;;  %p1108_p7 = pnand %p800_p10, %p50_p9  ;;  %s234_s30 = int_to_ptr.vmem [resolvable:$true] %s233_s30 }
  0x23   : > { %s221_s10 = scalar_lea.sflag [#allocation3], %s220_s14  ;;  %s908_s11 = scalar_lea.vmem %s234_s30, 128 }
  0x24   : > { %p897_p12 = pneg %p1108_p7  ;;  %p909_p13 = scmp.ne.s32.totalorder %s234_s30, %s908_s11 }
  0x25   : > { %s982_s12 = smov [#allocation2]  }
  0x26   : > { %p911_p0 = pnand %p909_p13, %p897_p12  ;;  %s913_s13 = sshll.u32 %s982_s12, 4  ;;  %s914_s13 = int_to_ptr.vmem [resolvable:$false] %s913_s13 }
  0x27   : > { %s915_s18 = scalar_lea.vmem %s914_s13, 256  ;;  %p916_p3 = scmp.lt.s32.totalorder %s234_s30, %s914_s13 }
  0x28   : > { %p912_p2 = pneg %p911_p0  ;;  %p917_p6 = scmp.lt.s32.totalorder %s915_s18, %s908_s11 }
  0x2a   : > { %p918_p8 = por %p917_p6, %p916_p3 }
  0x2c   : > { %p919_p9 = pnand %p918_p8, %p912_p2 }
  0x2e   : > { %922 = shalt.err (!%p919_p9)
}
  0x2f   : > { %798 = dma.hbm_to_vmem [thread:$0]  (!%p1108_p7), %s232_s28, 128, %s234_s30, %s221_s10, %s980_s8, %s980_s8, %s981_s9  }
  0x30   : > { %245 = sbr.rel (%p1068_p5) target bundleno = 418 (0x1a2), region = 32  ;;  %s247_s14 = sand.u32 (!%p1068_p5), 1, %s961_s19  }
  0x31   : > { %s733_s15 = sshll.u32 (!%p1068_p5), %s247_s14, 3  ;;  %s248_s16 = scalar_lea.sflag (!%p1068_p5), [#allocation3], %s247_s14 }
  0x32   : > { %s251_s24 = scalar_lea.vmem (!%p1068_p5), [#allocation2], %s733_s15 }
  0x35   : > { %948 = dma.done.wait (%p1064_p4), %s248_s16, 128  }
  0x36   : > { %950 = vsyncadd (%p1064_p4), %s248_s16, 4294967168 }
  0x37   : > { %952 = dma.done.wait (%p1056_p1), [#allocation5], 256  }
  0x38   : > { %954 = vsyncadd (%p1056_p1), [#allocation5], 4294967040  ;;  %v983_v0 = vmov 0.0   ;;  %vm984_vm0 = vmmov 0   ;;  %v866_v1 = vld [vmem:[#allocation4 + $0x8] sm:$0xff]   ;;  %v867_v2 = vld [vmem:[#allocation4] sm:$0xff]  }
  0x39   : > { %777 = vmatprep.subr.bf16.mxu0 %v983_v0  ;;  %781 = vmatprep.mubr.msk.bf16.mxu0 %vm984_vm0, %v983_v0  ;;  %v868_v3 = vld [vmem:[%s251_s24] sm:$0xff]   ;;  %vm366_vm1 = vcmask 261120   ;;  %p306_p4 = scmp.lt.s32.totalorder %s969_s21, 1  ;;  %vm419_vm2 = vcmask 60416   ;;  %s985_s29 = smov 64  }
  0x3a   : > { %778 = vmatpush3.bf16.msra.mxu0 %v866_v1  ;;  %v741_v4 = vld [vmem:[%s1225_s2] ss:$0 sm:$0xff]  ;;  %s986_s30 = smov 96   ;;  %s988_s7 = smov 88  }
  0x3b   : > { %779 = vmatprep.subr.bf16.mxu0 %v983_v0  ;;  %s1242_s21 = smov (!%p306_p4, %s969_s21), 1  ;;  %s989_s10 = smov 56  }
  0x3c   : > { %s1135_s25 = sshll.u32 %s1242_s21, 5  ;;  %s987_s21 = smov 120  }
  0x3d   : > { %s1141_s28 = scalar_lea.vmem %s1226_s3, %s1135_s25  ;;  %s990_s11 = smov 112  }
  0x3e   : > { %780 = vmatpush3.bf16.msra.mxu0 %v867_v2  ;;  %s991_s12 = smov 80   ;;  %s992_s13 = smov 48  }
  0x3f   : > { %s993_s18 = smov 104   ;;  %s994_s14 = smov 72  }
  0x40   : > { %s995_s15 = smov 40   ;;  %s1153_s26 = scalar_lea.vmem %s1228_s5, %s1135_s25 }
  0x41   : > { %782 = vmatmul.mubr.msk.bf16.vlgmr.msra.gmra.mxu0 %vm366_vm1, %v868_v3  ;;  %s1159_s9 = scalar_lea.vmem %s1227_s4, %s1135_s25 }
 0x101   : > { %v404_v5 = vpop.f32.mrf.mxu0 }
 0x102   : > { %v405_v6 = vadd.f32 %v741_v4, %v404_v5 }
 0x103   : > { %v783_v7 = vpop.f32.mrf.mxu0 }
 0x104   : > { %v772_v8 = vpack.c.bf16 %v405_v6, %v405_v6 }
 0x105   : > { %v407_v9 = vpop.f32.mrf.mxu0 }
 0x106   : > { %v408_v10 = vadd.f32 %v741_v4, %v407_v9  ;;  %430 = vrot.lane.b32.xlu1 %v772_v8, %s985_s29  ;;  %422 = vrot.lane.b32.xlu0 %v772_v8, %s986_s30  ;;  %420 = vst.msk [vmem:[%s1141_s28] sm:$0xf] %vm419_vm2, %v772_v8 }
 0x107   : > { %v784_v11 = vpop.f32.mrf.mxu0 }
 0x108   : > { %v773_v12 = vpack.c.bf16 %v408_v10, %v408_v10 }
 0x10a   : > { %438 = vrot.lane.b32.xlu0 %v772_v8, %s987_s21  ;;  %432 = vrot.lane.b32.xlu1 %v773_v12, %s985_s29  ;;  %421 = vst.msk [vmem:[%s1141_s28 + $0x4] sm:$0xf] %vm419_vm2, %v773_v12 }
 0x10e   : > { %447 = vrot.lane.b32.xlu0 %v772_v8, %s988_s7  ;;  %440 = vrot.lane.b32.xlu1 %v773_v12, %s987_s21 }
 0x112   : > { %456 = vrot.lane.b32.xlu0 %v772_v8, %s989_s10  ;;  %449 = vrot.lane.b32.xlu1 %v773_v12, %s988_s7 }
 0x116   : > { %465 = vrot.lane.b32.xlu0 %v772_v8, %s990_s11  ;;  %458 = vrot.lane.b32.xlu1 %v773_v12, %s989_s10 }
 0x11a   : > { %474 = vrot.lane.b32.xlu0 %v772_v8, %s991_s12  ;;  %467 = vrot.lane.b32.xlu1 %v773_v12, %s990_s11 }
 0x11e   : > { %483 = vrot.lane.b32.xlu0 %v772_v8, %s992_s13  ;;  %476 = vrot.lane.b32.xlu1 %v773_v12, %s991_s12 }
 0x122   : > { %492 = vrot.lane.b32.xlu0 %v772_v8, %s993_s18  ;;  %485 = vrot.lane.b32.xlu1 %v773_v12, %s992_s13 }
 0x126   : > { %501 = vrot.lane.b32.xlu0 %v772_v8, %s994_s14  ;;  %494 = vrot.lane.b32.xlu1 %v773_v12, %s993_s18 }
 0x12a   : > { %503 = vrot.lane.b32.xlu1 %v773_v12, %s994_s14  ;;  %424 = vrot.lane.b32.xlu0 %v773_v12, %s986_s30 }
 0x12e   : > { %512 = vrot.lane.b32.xlu1 %v773_v12, %s995_s15  ;;  %510 = vrot.lane.b32.xlu0 %v772_v8, %s995_s15 }
 0x178   : > { %v431_v13 = vpop.permute.xlu1 %430  ;;  %v423_v14 = vpop.permute.xlu0 %422 }
 0x179   : > { %436 = vst.msk [vmem:[%s1153_s26] sm:$0xf] %vm419_vm2, %v431_v13  ;;  %428 = vst.msk [vmem:[%s1159_s9] sm:$0xf] %vm419_vm2, %v423_v14 }
 0x17c   : > { %v439_v15 = vpop.permute.xlu0 %438  ;;  %v433_v16 = vpop.permute.xlu1 %432 }
 0x17d   : > { %748 = vst.msk [vmem:[%s1141_s28 + $0x8] sm:$0xf] %vm419_vm2, %v439_v15  ;;  %437 = vst.msk [vmem:[%s1153_s26 + $0x4] sm:$0xf] %vm419_vm2, %v433_v16 }
 0x180   : > { %v448_v17 = vpop.permute.xlu0 %447  ;;  %v441_v18 = vpop.permute.xlu1 %440 }
 0x181   : > { %750 = vst.msk [vmem:[%s1159_s9 + $0x8] sm:$0xf] %vm419_vm2, %v448_v17  ;;  %749 = vst.msk [vmem:[%s1141_s28 + $0xc] sm:$0xf] %vm419_vm2, %v441_v18 }
 0x184   : > { %v457_v19 = vpop.permute.xlu0 %456  ;;  %v450_v20 = vpop.permute.xlu1 %449 }
 0x185   : > { %752 = vst.msk [vmem:[%s1153_s26 + $0x8] sm:$0xf] %vm419_vm2, %v457_v19  ;;  %751 = vst.msk [vmem:[%s1159_s9 + $0xc] sm:$0xf] %vm419_vm2, %v450_v20 }
 0x188   : > { %v466_v21 = vpop.permute.xlu0 %465  ;;  %v459_v22 = vpop.permute.xlu1 %458 }
 0x189   : > { %754 = vst.msk [vmem:[%s1141_s28 + $0x10] sm:$0xf] %vm419_vm2, %v466_v21  ;;  %753 = vst.msk [vmem:[%s1153_s26 + $0xc] sm:$0xf] %vm419_vm2, %v459_v22 }
 0x18c   : > { %v475_v23 = vpop.permute.xlu0 %474  ;;  %v468_v24 = vpop.permute.xlu1 %467 }
 0x18d   : > { %756 = vst.msk [vmem:[%s1159_s9 + $0x10] sm:$0xf] %vm419_vm2, %v475_v23  ;;  %755 = vst.msk [vmem:[%s1141_s28 + $0x14] sm:$0xf] %vm419_vm2, %v468_v24 }
 0x190   : > { %v484_v25 = vpop.permute.xlu0 %483  ;;  %v477_v26 = vpop.permute.xlu1 %476 }
 0x191   : > { %758 = vst.msk [vmem:[%s1153_s26 + $0x10] sm:$0xf] %vm419_vm2, %v484_v25  ;;  %757 = vst.msk [vmem:[%s1159_s9 + $0x14] sm:$0xf] %vm419_vm2, %v477_v26 }
 0x194   : > { %v493_v27 = vpop.permute.xlu0 %492  ;;  %v486_v28 = vpop.permute.xlu1 %485 }
 0x195   : > { %760 = vst.msk [vmem:[%s1141_s28 + $0x18] sm:$0xf] %vm419_vm2, %v493_v27  ;;  %759 = vst.msk [vmem:[%s1153_s26 + $0x14] sm:$0xf] %vm419_vm2, %v486_v28 }
 0x198   : > { %v502_v29 = vpop.permute.xlu0 %501  ;;  %v495_v30 = vpop.permute.xlu1 %494 }
 0x199   : > { %762 = vst.msk [vmem:[%s1159_s9 + $0x18] sm:$0xf] %vm419_vm2, %v502_v29  ;;  %761 = vst.msk [vmem:[%s1141_s28 + $0x1c] sm:$0xf] %vm419_vm2, %v495_v30 }
 0x19c   : > { %v504_v31 = vpop.permute.xlu1 %503  ;;  %v425_v32 = vpop.permute.xlu0 %424 }
 0x19d   : > { %763 = vst.msk [vmem:[%s1159_s9 + $0x1c] sm:$0xf] %vm419_vm2, %v504_v31  ;;  %429 = vst.msk [vmem:[%s1159_s9 + $0x4] sm:$0xf] %vm419_vm2, %v425_v32 }
 0x1a0   : > { %v513_v33 = vpop.permute.xlu1 %512  ;;  %v511_v34 = vpop.permute.xlu0 %510 }
 0x1a1   : > { %765 = vst.msk [vmem:[%s1153_s26 + $0x1c] sm:$0xf] %vm419_vm2, %v513_v33  ;;  %764 = vst.msk [vmem:[%s1153_s26 + $0x18] sm:$0xf] %vm419_vm2, %v511_v34 }
 0x1a2 PF: > { %s20_s23 = sadd.s32 1, %s977_s23   ;;  %s1234_s18 = smov %s961_s19 }
 0x1a3   : > { %p17_p1 = scmp.ge.s32.totalorder %s20_s23, 4   ;;  %s1235_s19 = smov %s965_s20 }
 0x1a4   : > { %s1236_s20 = smov %s1103_s17  ;;  %s1237_s21 = smov %s973_s22 }
 0x1a5   : > { %s1238_s22 = smov %s1240_s6  ;;  %19 = sbr.rel (!%p17_p1) target bundleno = 5 (0x5), region = 109 }
 0x1aa   :  { %599 = vsyncpa [#allocation3], 1 }
 0x1ab   :  { %601 = vsyncpa [#allocation3 + $0x1], 1 }
 0x1ac   :  { %602 = vsyncpa [#allocation5], 1 }

</bundles_post_ra>
